<compile_context>
chip_gen: v7x
topology: tpu7x:2x2x1
jax: 0.10.0
libtpu: 0.0.40
codegen_flags: <defaults>
</compile_context>

<pallas_src>
import math

import jax
import jax.numpy as jnp
import numpy as np
from jax.experimental import pallas as pl
from jax.experimental.pallas import tpu as pltpu

LOG_2PI = math.log(2.0 * math.pi)


def _round_up(n, m):
    return ((n + m - 1) // m) * m


def _nll_kernel(const_ref, x_ref, mu_ref, minv_ref, out_ref):
    # diff_b = x_b - mu  (fused; mu broadcast over the TB sublanes)
    diff = x_ref[...] - mu_ref[...]                                   # (TB, Dp)
    # y_b = aux^{-1} (x_b - mu)  computed row-wise:  Y = diff @ aux^{-T}
    y = jnp.dot(diff, minv_ref[...], preferred_element_type=jnp.float32)
    yy = y * y
    # Row-wise squared norm on the MXU -> lane-dense (TB, 128) output block
    # (every lane of a row holds the same ||y_b||^2); wrapper reads column 0.
    ones = jnp.ones((yy.shape[-1], 128), dtype=jnp.float32)
    q = jnp.dot(yy, ones, preferred_element_type=jnp.float32)         # (TB, 128)
    out_ref[...] = 0.5 * q + const_ref[0]


def _choose_tile_b(bp, dp):
    """Pick a batch tile that keeps double-buffered VMEM usage ~<= 24 MiB."""
    budget = 24 * 1024 * 1024
    fixed = 4 * (2 * dp * dp + 2 * dp)            # resident minv (+ headroom) and mu
    per_row = 4 * (2 * dp + 2 * 128)              # double-buffered x block + out block
    tb = (budget - fixed) // per_row
    tb = int(max(8, min(512, tb)))
    tb = (tb // 8) * 8
    return min(tb, bp)


def _nll_pallas(x_flat, mu_pad, minv_pad, const_val):
    B, D = x_flat.shape
    Dp = mu_pad.shape[-1]

    Bp8 = _round_up(max(B, 1), 8)
    TB = _choose_tile_b(Bp8, Dp)
    grid_b = pl.cdiv(Bp8, TB)
    Bp = grid_b * TB

    # Zero-pad rows (extra batch rows) and columns (extra feature dims).
    x_pad = jnp.pad(x_flat, ((0, Bp - B), (0, Dp - D)))

    const_arr = jnp.asarray([const_val], dtype=jnp.float32)

    # VMEM budget: double-buffered x/out blocks + resident minv/mu, with headroom.
    est = 4 * (2 * TB * Dp + 2 * TB * 128 + 2 * Dp * Dp + 2 * Dp)
    vmem_limit = int(min(64 * 1024 * 1024, max(int(est * 1.5) + (2 << 20),
                                               4 * 1024 * 1024)))

    out = pl.pallas_call(
        _nll_kernel,
        out_shape=jax.ShapeDtypeStruct((Bp, 128), jnp.float32),
        grid=(grid_b,),
        in_specs=[
            pl.BlockSpec(memory_space=pltpu.MemorySpace.SMEM),        # const scalar
            pl.BlockSpec((TB, Dp), lambda i: (i, 0)),                 # x tile (streams)
            pl.BlockSpec((1, Dp), lambda i: (0, 0)),                  # mu (resident)
            pl.BlockSpec((Dp, Dp), lambda i: (0, 0)),                 # minv (resident)
        ],
        out_specs=pl.BlockSpec((TB, 128), lambda i: (i, 0)),
        compiler_params=pltpu.CompilerParams(
            dimension_semantics=("parallel",),
            vmem_limit_bytes=vmem_limit,
        ),
    )(const_arr, x_pad, mu_pad, minv_pad)

    return out[:B, 0]


class GaussianPallas:
    def __init__(self, dim=100, key=jax.random.PRNGKey(0)):
        self.dim = int(np.prod(dim))
        k_mu, k_ld, k_lt = jax.random.split(key, 3)
        # Deterministic synthetic init (mirrors torch.normal(0, 1) shapes).
        self.mu = jax.random.normal(k_mu, (self.dim,), dtype=jnp.float32)
        self.log_diagonal = jax.random.normal(k_ld, (self.dim,), dtype=jnp.float32)
        rows, cols = np.tril_indices(self.dim, -1)
        self.tril_rows = jnp.asarray(rows)
        self.tril_cols = jnp.asarray(cols)
        self.lower_tri = jax.random.normal(k_lt, (len(rows),), dtype=jnp.float32)

        # --- parameter-only precompute (hoisted out of forward) -------------
        D = self.dim
        Dp = _round_up(D, 128)
        self._dim_padded = Dp

        aux = self.get_aux()
        # aux is the (unique lower-tri) Cholesky factor of cov; invert it once.
        ainv = jax.scipy.linalg.solve_triangular(
            aux, jnp.eye(D, dtype=jnp.float32), lower=True)
        minv = ainv.T                                   # diff @ minv == (aux^{-1} diff^T)^T

        # Zero-padded operands (padding is a no-op for the Mahalanobis term).
        self._minv_pad = jnp.zeros((Dp, Dp), jnp.float32).at[:D, :D].set(minv)
        self._mu_pad = jnp.zeros((1, Dp), jnp.float32).at[0, :D].set(self.mu)
        # Loop-invariant additive constant uses the ORIGINAL D.
        self._const = float(jnp.sum(self.log_diagonal)) + 0.5 * D * LOG_2PI

    def get_aux(self):
        aux = jnp.zeros((self.dim, self.dim), dtype=jnp.float32)
        aux = aux.at[self.tril_rows, self.tril_cols].set(self.lower_tri)
        aux = aux + jnp.diag(jnp.exp(self.log_diagonal))
        return aux

    def get_cov(self):
        aux = self.get_aux()
        return aux @ aux.T

    def forward(self, x, mask):
        # Full-mask precondition checked only on concrete (non-traced) masks so the
        # hot path stays jit-friendly (no device->host sync under tracing).
        if mask is not None and not isinstance(mask, jax.core.Tracer):
            if not np.all(np.asarray(mask).astype(bool)):
                # TODO(synk): the partial-mask branch builds a per-sample MVN over a
                # data-dependent subset of dimensions (dynamic-shape sub-covariance +
                # per-row Cholesky); no clean Pallas equivalent.
                raise NotImplementedError("partial mask path not implemented")

        B = x.shape[0]
        x_flat = x.reshape(B, -1).astype(jnp.float32)
        nll = _nll_pallas(x_flat, self._mu_pad, self._minv_pad, self._const)
        return nll, None


def _reference_nll(model, x):
    B = x.shape[0]
    x_flat = x.reshape(B, -1).astype(jnp.float32)
    diff = x_flat - model.mu[None, :]
    aux = model.get_aux()
    y = jax.scipy.linalg.solve_triangular(aux, diff.T, lower=True)
    q = jnp.sum(y * y, axis=0)
    return 0.5 * q + jnp.sum(model.log_diagonal) + 0.5 * model.dim * LOG_2PI


if __name__ == "__main__":
    key = jax.random.PRNGKey(0)
    k_param, k_x = jax.random.split(key)

    B, C, H, W = 7, 2, 4, 4          # flattened feature dim D = C*H*W = 32
    D = C * H * W

    model = GaussianPallas(dim=D, key=k_param)

    x = jax.random.normal(k_x, (B, C, H, W), dtype=jnp.float32)
    mask = jnp.ones((B, C, H, W), dtype=jnp.bool_)

    nll, _ = model.forward(x, mask)
    nll = jax.block_until_ready(nll)

    ref = _reference_nll(model, x)
    assert nll.shape == (B,)
    np.testing.assert_allclose(np.asarray(nll), np.asarray(ref), rtol=1e-4, atol=1e-4)

    print("KERNEL_OK")
</pallas_src>

<mosaic_0001>
module attributes {stable_mosaic.version = 11 : i64} {
  func.func @_nll_kernel(%arg0: i32, %arg1: memref<1xf32, #tpu.memory_space<smem>>, %arg2: memref<8x128xf32, #tpu.memory_space<vmem>>, %arg3: memref<1x128xf32, #tpu.memory_space<vmem>>, %arg4: memref<128x128xf32, #tpu.memory_space<vmem>>, %arg5: memref<8x128xf32, #tpu.memory_space<vmem>>) attributes {dimension_semantics = [#tpu.dimension_semantics<parallel>], iteration_bounds = array<i64: 1>, scalar_prefetch = 0 : i64, scratch_operands = 0 : i64, tpu.core_type = #tpu.core_type<tc>, window_params = [{transform_indices = @transform_0, window_bounds = array<i64: 1>}, {transform_indices = @transform_1, window_bounds = array<i64: 8, 128>}, {pipeline_mode = #tpu.pipeline_mode<synchronous>, transform_indices = @transform_2, window_bounds = array<i64: 1, 128>}, {pipeline_mode = #tpu.pipeline_mode<synchronous>, transform_indices = @transform_3, window_bounds = array<i64: 128, 128>}, {transform_indices = @transform_4, window_bounds = array<i64: 8, 128>}]} {
    %c0 = arith.constant 0 : index
    %c0_0 = arith.constant 0 : index
    %0 = vector.load %arg2[%c0, %c0_0] : memref<8x128xf32, #tpu.memory_space<vmem>>, vector<8x128xf32>
    %c0_1 = arith.constant 0 : index
    %c0_2 = arith.constant 0 : index
    %1 = vector.load %arg3[%c0_1, %c0_2] : memref<1x128xf32, #tpu.memory_space<vmem>>, vector<1x128xf32>
    %2 = vector.broadcast %1 : vector<1x128xf32> to vector<8x128xf32>
    %3 = arith.subf %0, %2 : vector<8x128xf32>
    %c0_3 = arith.constant 0 : index
    %c0_4 = arith.constant 0 : index
    %4 = vector.load %arg4[%c0_3, %c0_4] : memref<128x128xf32, #tpu.memory_space<vmem>>, vector<128x128xf32>
    %cst = arith.constant dense<0.000000e+00> : vector<8x128xf32>
    %5 = tpu.matmul %3, %4, %cst {dimension_numbers = #tpu.dot_dimension_numbers<[1], [0], [0], [1], [0, 0, 1, 1], [], []>} : vector<8x128xf32>, vector<128x128xf32>, vector<8x128xf32> -> vector<8x128xf32>
    %6 = arith.mulf %5, %5 : vector<8x128xf32>
    %cst_5 = arith.constant 1.000000e+00 : f32
    %7 = vector.broadcast %cst_5 : f32 to vector<128x128xf32>
    %cst_6 = arith.constant dense<0.000000e+00> : vector<8x128xf32>
    %8 = tpu.matmul %6, %7, %cst_6 {dimension_numbers = #tpu.dot_dimension_numbers<[1], [0], [0], [1], [0, 0, 1, 1], [], []>} : vector<8x128xf32>, vector<128x128xf32>, vector<8x128xf32> -> vector<8x128xf32>
    %cst_7 = arith.constant 5.000000e-01 : f32
    %9 = vector.broadcast %cst_7 : f32 to vector<8x128xf32>
    %10 = arith.mulf %9, %8 : vector<8x128xf32>
    %c0_8 = arith.constant 0 : index
    %11 = memref.load %arg1[%c0_8] : memref<1xf32, #tpu.memory_space<smem>>
    %12 = vector.broadcast %11 : f32 to vector<8x128xf32>
    %13 = arith.addf %10, %12 : vector<8x128xf32>
    %c0_9 = arith.constant 0 : index
    %c0_10 = arith.constant 0 : index
    %14 = vector.load %arg5[%c0_9, %c0_10] : memref<8x128xf32, #tpu.memory_space<vmem>>, vector<8x128xf32>
    tpu.vector_store %arg5[%c0_9, %c0_10], %13 {strides = array<i32>} : memref<8x128xf32, #tpu.memory_space<vmem>>, vector<8x128xf32>,
    return
  }
  func.func @transform_0(%arg0: i32) -> i32 {
    %c0_i32 = arith.constant 0 : i32
    %c0_i32_0 = arith.constant 0 : i32
    return %c0_i32 : i32
  }
  func.func @transform_1(%arg0: i32) -> (i32, i32) {
    %c0_i32 = arith.constant 0 : i32
    %c0_i32_0 = arith.constant 0 : i32
    return %arg0, %c0_i32 : i32, i32
  }
  func.func @transform_2(%arg0: i32) -> (i32, i32) {
    %c0_i32 = arith.constant 0 : i32
    %c0_i32_0 = arith.constant 0 : i32
    %c0_i32_1 = arith.constant 0 : i32
    return %c0_i32, %c0_i32_0 : i32, i32
  }
  func.func @transform_3(%arg0: i32) -> (i32, i32) {
    %c0_i32 = arith.constant 0 : i32
    %c0_i32_0 = arith.constant 0 : i32
    %c0_i32_1 = arith.constant 0 : i32
    return %c0_i32, %c0_i32_0 : i32, i32
  }
  func.func @transform_4(%arg0: i32) -> (i32, i32) {
    %c0_i32 = arith.constant 0 : i32
    %c0_i32_0 = arith.constant 0 : i32
    return %arg0, %c0_i32 : i32, i32
  }
}

</mosaic_0001>

<bundles_post_ra>
// kernel: tpu_custom_call.1
= control target key start
LH: loop header
LB: loop body
LE: loop exit
PB: predicated region body
PF: predicated region fallthrough
CT: control target
= control target key end

     0   :  { %10 = vsyncpa [#allocation4], 0  ;;  %s541_s0 = inlined_call_operand.<no memory space> [shape: f32[1], index: 0, kind: input, shape index: {}]   ;;  %s542_s1 = inlined_call_operand.hbm [shape: f32[8,128], index: 1, kind: input, shape index: {}]   ;;  %s543_s2 = inlined_call_operand.vmem [shape: f32[1,128], index: 2, kind: input, shape index: {}]   ;;  %s544_s3 = inlined_call_operand.hbm [shape: f32[128,128], index: 3, kind: input, shape index: {}]   ;;  %s545_s4 = inlined_call_operand.hbm [shape: f32[8,128], index: 4, kind: output, shape index: {}]  }
   0x1   :  { %11 = vsyncpa [#allocation7], 0 }
   0x2   :  { %12 = vsyncpa [#allocation5], 0  ;;  %s458_s15 = smov [#allocation3]   ;;  %s459_s17 = smov [#allocation6]  }
   0x3   :  { %s21_s16 = sshll.u32 %s458_s15, 4  ;;  %s32_s18 = sshll.u32 %s459_s17, 4  ;;  %s22_s16 = int_to_ptr.vmem [resolvable:$true] %s21_s16  ;;  %s492_s18 = int_to_ptr.vmem [resolvable:$true] %s32_s18 }
   0x4   :  { %s386_s21 = scalar_lea.hbm %s542_s1, 128 }
   0x5   :  { %p387_p0 = scmp.ne.s32.totalorder %s542_s1, %s386_s21  ;;  %p390_p1 = scmp.lt.u32.totalorder %s386_s21, %s542_s1 }
   0x7   :  { %p392_p2 = pnand %p390_p1, %p387_p0 }
   0x9   :  { %395 = shalt.err (!%p392_p2)
}
   0xa   :  { %s396_s26 = scalar_lea.vmem %s22_s16, 128  ;;  %p401_p4 = scmp.lt.s32.totalorder %s22_s16, %s22_s16 }
   0xb   :  { %p397_p3 = scmp.ne.s32.totalorder %s22_s16, %s396_s26  ;;  %p402_p5 = scmp.lt.s32.totalorder %s396_s26, %s396_s26 }
   0xd   :  { %p403_p6 = por %p402_p5, %p401_p4 }
   0xf   :  { %p404_p7 = pnand %p403_p6, %p397_p3 }
  0x11   :  { %407 = shalt.err (!%p404_p7)
}
  0x12   :  { %24 = dma.hbm_to_vmem [thread:$0]  %s542_s1, 128, %s22_s16, [#allocation4]  }
  0x13   :  { %s408_s5 = scalar_lea.hbm %s544_s3, 2048 }
  0x14   :  { %p409_p8 = scmp.ne.s32.totalorder %s544_s3, %s408_s5  ;;  %p412_p9 = scmp.lt.u32.totalorder %s408_s5, %s544_s3 }
  0x16   :  { %p414_p10 = pnand %p412_p9, %p409_p8 }
  0x18   :  { %417 = shalt.err (!%p414_p10)
}
  0x19   :  { %s418_s10 = scalar_lea.vmem %s492_s18, 2048  ;;  %p423_p12 = scmp.lt.s32.totalorder %s492_s18, %s492_s18 }
  0x1a   :  { %p419_p11 = scmp.ne.s32.totalorder %s492_s18, %s418_s10  ;;  %p424_p13 = scmp.lt.s32.totalorder %s418_s10, %s418_s10 }
  0x1c   :  { %p425_p0 = por %p424_p13, %p423_p12 }
  0x1e   :  { %p426_p1 = pnand %p425_p0, %p419_p11 }
  0x20   :  { %429 = shalt.err (!%p426_p1)
}
  0x21   :  { %s460_s1 = smov 128   ;;  %s461_s11 = smov 8  }
  0x22   :  { %38 = dma.hbm_to_vmem [thread:$0]  %s544_s3, 2048, %s492_s18, [#allocation7], %s460_s1, %s460_s1, %s461_s11  }
  0x23   :  { %452 = dma.done.wait [#allocation4], 128  }
  0x24   :  { %453 = vsyncadd [#allocation4], 4294967168 }
  0x25   :  { %454 = dma.done.wait [#allocation7], 2048  }
  0x26   :  { %455 = vsyncadd [#allocation7], 4294965248  ;;  %v462_v0 = vmov 0.0|0.0   ;;  %vm463_vm0 = vmmov 0   ;;  %v464_v1 = vmov 0.0   ;;  %v54_v3 = vld [vmem:[#allocation6] sm:$0xff]  ;;  %v213_v34 = vstv %s541_s0 }
  0x27   :  { %337 = vmatprep.subr.bf16.mxu0 %v462_v0  ;;  %299 = vmatprep.mubr.msk.f32.mxu0 %vm463_vm0, %v464_v1  ;;  %v465_v2 = vmov 1.0|1.0   ;;  %v55_v4 = vld [vmem:[#allocation6 + $0x8] sm:$0xff]  ;;  %v56_v5 = vld [vmem:[#allocation6 + $0x10] sm:$0xff]  ;;  %v57_v7 = vld [vmem:[#allocation6 + $0x18] sm:$0xff]  ;;  %s466_s17 = smov [#allocation8]  }
  0x28   :  { %361 = vmatprep.subr.bf16.mxu1 %v462_v0  ;;  %334 = vmatprep.mubr.msk.f32.mxu1 %vm463_vm0, %v464_v1  ;;  %v338_v6 = vpack.c.bf16 %v55_v4, %v54_v3  ;;  %v341_v8 = vpack.c.bf16 %v57_v7, %v56_v5  ;;  %v58_v9 = vld [vmem:[#allocation6 + $0x20] sm:$0xff]  ;;  %v59_v10 = vld [vmem:[#allocation6 + $0x28] sm:$0xff]  ;;  %v60_v12 = vld [vmem:[#allocation6 + $0x30] sm:$0xff]  ;;  %s222_s18 = sshll.u32 %s466_s17, 4  ;;  %s223_s18 = int_to_ptr.vmem [resolvable:$true] %s222_s18 }
  0x29   :  { %362 = vmatpush3.bf16.msra.mxu1 %v465_v2  ;;  %v344_v11 = vpack.c.bf16 %v59_v10, %v58_v9  ;;  %v61_v13 = vld [vmem:[#allocation6 + $0x38] sm:$0xff]  ;;  %v62_v15 = vld [vmem:[#allocation6 + $0x40] sm:$0xff]  ;;  %v63_v16 = vld [vmem:[#allocation6 + $0x48] sm:$0xff]  ;;  %p435_p3 = scmp.lt.s32.totalorder %s223_s18, %s223_s18 }
  0x2a   :  { %363 = vmatprep.subr.bf16.mxu1 %v462_v0  ;;  %339 = vmatpush3.bf16.msra.mxu0 %v338_v6  ;;  %v347_v14 = vpack.c.bf16 %v61_v13, %v60_v12  ;;  %v350_v17 = vpack.c.bf16 %v63_v16, %v62_v15  ;;  %v64_v18 = vld [vmem:[#allocation6 + $0x50] sm:$0xff]  ;;  %v65_v19 = vld [vmem:[#allocation6 + $0x58] sm:$0xff]  ;;  %v66_v21 = vld [vmem:[#allocation6 + $0x60] sm:$0xff] }
  0x2b   :  { %340 = vmatprep.subr.bf16.mxu0 %v462_v0  ;;  %v353_v20 = vpack.c.bf16 %v65_v19, %v64_v18  ;;  %v67_v22 = vld [vmem:[#allocation6 + $0x68] sm:$0xff]  ;;  %v68_v24 = vld [vmem:[#allocation6 + $0x70] sm:$0xff]  ;;  %v69_v25 = vld [vmem:[#allocation6 + $0x78] sm:$0xff] }
  0x2c   :  { %v356_v23 = vpack.c.bf16 %v67_v22, %v66_v21  ;;  %v359_v26 = vpack.c.bf16 %v69_v25, %v68_v24  ;;  %v45_v27 = vld [vmem:[#allocation3] sm:$0xff] }
  0x2d   :  { %364 = vmatpush3.bf16.msra.mxu1 %v465_v2  ;;  %v232_v28 = vld [vmem:[%s543_s2] ss:$0 sm:$0xff]  ;;  %s430_s2 = scalar_lea.vmem %s223_s18, 128 }
  0x2e   :  { %365 = vmatprep.subr.bf16.mxu1 %v462_v0  ;;  %342 = vmatpush3.bf16.msra.mxu0 %v341_v8  ;;  %v53_v29 = vsub.f32 %v45_v27, %v232_v28  ;;  %p431_p2 = scmp.ne.s32.totalorder %s223_s18, %s430_s2  ;;  %p436_p4 = scmp.lt.s32.totalorder %s430_s2, %s430_s2 }
  0x2f   :  { %343 = vmatprep.subr.bf16.mxu0 %v462_v0 }
  0x30   :  { %p437_p5 = por %p436_p4, %p435_p3 }
  0x31   :  { %366 = vmatpush3.bf16.msra.mxu1 %v465_v2 }
  0x32   :  { %367 = vmatprep.subr.bf16.mxu1 %v462_v0  ;;  %345 = vmatpush3.bf16.msra.mxu0 %v344_v11  ;;  %p438_p6 = pnand %p437_p5, %p431_p2 }
  0x33   :  { %346 = vmatprep.subr.bf16.mxu0 %v462_v0 }
  0x35   :  { %368 = vmatpush3.bf16.msra.mxu1 %v465_v2 }
  0x36   :  { %369 = vmatprep.subr.bf16.mxu1 %v462_v0  ;;  %348 = vmatpush3.bf16.msra.mxu0 %v347_v14 }
  0x37   :  { %349 = vmatprep.subr.bf16.mxu0 %v462_v0 }
  0x39   :  { %370 = vmatpush3.bf16.msra.mxu1 %v465_v2 }
  0x3a   :  { %371 = vmatprep.subr.bf16.mxu1 %v462_v0  ;;  %351 = vmatpush3.bf16.msra.mxu0 %v350_v17 }
  0x3b   :  { %352 = vmatprep.subr.bf16.mxu0 %v462_v0 }
  0x3d   :  { %372 = vmatpush3.bf16.msra.mxu1 %v465_v2 }
  0x3e   :  { %373 = vmatprep.subr.bf16.mxu1 %v462_v0  ;;  %354 = vmatpush3.bf16.msra.mxu0 %v353_v20 }
  0x3f   :  { %355 = vmatprep.subr.bf16.mxu0 %v462_v0 }
  0x41   :  { %374 = vmatpush3.bf16.msra.mxu1 %v465_v2 }
  0x42   :  { %375 = vmatprep.subr.bf16.mxu1 %v462_v0  ;;  %357 = vmatpush3.bf16.msra.mxu0 %v356_v23 }
  0x43   :  { %358 = vmatprep.subr.bf16.mxu0 %v462_v0 }
  0x45   :  { %376 = vmatpush3.bf16.msra.mxu1 %v465_v2 }
  0x46   :  { %360 = vmatpush3.bf16.msra.mxu0 %v359_v26 }
  0x49   :  { %300 = vmatmul.mubr.f32.vlgmr.msra.gmra.mrb[0].mxu0 %v53_v29 }
 0x11c   :  { %v136_v30 = vpop.f32.mrb[0].mxu0 }
 0x11d   :  { %v140_v31 = vmul.f32 %v136_v30, %v136_v30  ;;  %v301_v32 = vpop.f32.mrb[1].mxu0 }
 0x11f   :  { %335 = vmatmul.mubr.f32.vlgmr.msra.gmra.mrb[0].mxu1 %v140_v31 }
 0x1f2   :  { %v207_v33 = vpop.f32.mrb[0].mxu1 }
 0x1f3   :  { %v211_v35 = vmul.f32 0.5, %v207_v33  ;;  %v336_v36 = vpop.f32.mrb[1].mxu1 }
 0x1f5   :  { %v214_v37 = vadd.f32 %v213_v34, %v211_v35 }
 0x1f7   :  { %215 = vst [vmem:[#allocation8] sm:$0xff] %v214_v37 }
 0x1f8   :  { %441 = shalt.err (!%p438_p6)
}
 0x1f9   :  { %s442_s21 = scalar_lea.hbm %s545_s4, 128 }
 0x1fa   :  { %p443_p7 = scmp.ne.s32.totalorder %s545_s4, %s442_s21  ;;  %p446_p8 = scmp.lt.u32.totalorder %s442_s21, %s545_s4 }
 0x1fc   :  { %p448_p9 = pnand %p446_p8, %p443_p7 }
 0x1fe   :  { %451 = shalt.err (!%p448_p9)
}
 0x1ff   :  { %225 = dma.vmem_to_hbm [thread:$0]  %s223_s18, 128, %s545_s4, [#allocation5]  }
 0x200   :  { %456 = dma.done.wait [#allocation5], 128  }
 0x201   :  { %457 = vsyncadd [#allocation5], 4294967168 }
 0x202   :  { %229 = vsyncpa [#allocation4], 1 }
 0x203   :  { %230 = vsyncpa [#allocation7], 1 }
 0x204   :  { %231 = vsyncpa [#allocation5], 1 }

</bundles_post_ra>
